<compile_context>
chip_gen: v7x
topology: tpu7x:2x2x1
jax: 0.10.0
libtpu: 0.0.40
codegen_flags: <defaults>
</compile_context>

<pallas_src>
import functools
import math

import jax
import jax.numpy as jnp
from jax.experimental import pallas as pl
from jax.experimental.pallas import tpu as pltpu


# ----------------------- generation-aware tuning knobs -----------------------
def _tpu_generation():
    try:
        kind = jax.devices()[0].device_kind.lower()
    except Exception:
        return 0
    for gen in (7, 6, 5):
        if f"v{gen}" in kind:
            return gen
    return 0


_GEN = _tpu_generation()
# v5e/v6e MXUs have a native int8 datapath (~2x bf16 TOPS) and int8 halves the weight
# footprint/DMA; v7x has no integer MXU (fp8 cannot carry int8 codes exactly) -> bf16.
_USE_INT8_MXU = _GEN in (5, 6)
# v5e/v6e: 128 MiB physical VMEM -> large scoped limit; v7x: 64 MiB physical -> leave
# headroom for compiler scratch; unknown parts keep the conservative 64 MiB request.
_VMEM_LIMIT = {5: 100 * 2**20, 6: 100 * 2**20, 7: 48 * 2**20}.get(_GEN, 64 * 2**20)
# Bigger row tiles amortize per-grid-step overhead on the 128 MiB parts.
_BITLINEAR_TM = 512 if _GEN in (5, 6) else 256


def _round_up(x, m):
    return ((x + m - 1) // m) * m


# ----------------------------- BitLinear kernel -----------------------------
def _bitlinear_kernel(x_ref, g_ref, wt_ref, wdeq_ref, o_ref, *, use_int8):
    """x: [tm, Din], g: [1, Din] f32, wt: [Din, Dout] ternary codes (int8 or bf16),
    wdeq: [1] f32 in SMEM (= clamped mean|W| / 127), o: [tm, Dout].

    RMSNorm(eps=1e-6) -> per-row int8-absmax codes (exact small integers) -> MXU matmul
    against the ternary weight codes (int32 or f32 accumulate) -> exact post-matmul dequant.
    """
    x = x_ref[...].astype(jnp.float32)
    g = g_ref[...]
    ms = jnp.mean(x * x, axis=-1, keepdims=True)
    xn = x * jax.lax.rsqrt(ms + 1e-6) * g
    absmax = jnp.maximum(jnp.max(jnp.abs(xn), axis=-1, keepdims=True), 1e-5)
    codes = jnp.clip(jnp.round(xn * (127.0 / absmax)), -128.0, 127.0)
    if use_int8:
        acc = jnp.dot(codes.astype(jnp.int8), wt_ref[...],
                      preferred_element_type=jnp.int32).astype(jnp.float32)
    else:
        acc = jnp.dot(codes.astype(jnp.bfloat16), wt_ref[...],
                      preferred_element_type=jnp.float32)
    # dequant reuses absmax (no per-row divide): (absmax/127) * mean|W|
    o_ref[...] = (acc * (absmax * wdeq_ref[0])).astype(o_ref.dtype)


def prepare_bitlinear(w, g):
    """One-time weight_quant (ternary absmean) + RMSNorm-gain prep, hoisted out of the
    per-forward path so the weight is not re-read/converted every call."""
    ws = 1.0 / jnp.maximum(jnp.mean(jnp.abs(w)), 1e-5)
    codes = jnp.clip(jnp.round(w * ws), -1.0, 1.0)           # {-1, 0, +1}
    wt_dtype = jnp.int8 if _USE_INT8_MXU else jnp.bfloat16
    return dict(
        wt=codes.T.astype(wt_dtype),                         # [Din, Dout] ternary codes
        w_deq=((1.0 / ws) / 127.0).reshape(1).astype(jnp.float32),
        g=g.reshape(1, -1).astype(jnp.float32),
    )


def bitlinear(x2d, prep, *, out_dtype=None, tm=None):
    """BitLinear forward.  x2d: [N, Din]; prep from prepare_bitlinear()."""
    N, Din = x2d.shape
    wt = prep["wt"]
    Dout = wt.shape[1]
    out_dtype = out_dtype or x2d.dtype
    tm = tm or _BITLINEAR_TM
    tm = max(8, min(tm, _round_up(N, 8)))                    # small-N fallback
    n_pad = pl.cdiv(N, tm) * tm
    x_in = jnp.pad(x2d, ((0, n_pad - N), (0, 0))) if n_pad != N else x2d

    out = pl.pallas_call(
        functools.partial(_bitlinear_kernel, use_int8=_USE_INT8_MXU),
        out_shape=jax.ShapeDtypeStruct((n_pad, Dout), out_dtype),
        grid_spec=pltpu.PrefetchScalarGridSpec(
            num_scalar_prefetch=0,
            grid=(n_pad // tm,),
            in_specs=[
                pl.BlockSpec((tm, Din), lambda i: (i, 0)),
                # grid-invariant blocks: single-buffer so the big resident weight isn't
                # allocated twice in VMEM (constant index => Pallas never re-DMAs it).
                pl.BlockSpec((1, Din), lambda i: (0, 0), pipeline_mode=pl.Buffered(1)),
                pl.BlockSpec((Din, Dout), lambda i: (0, 0), pipeline_mode=pl.Buffered(1)),
                pl.BlockSpec(memory_space=pltpu.MemorySpace.SMEM),
            ],
            out_specs=pl.BlockSpec((tm, Dout), lambda i: (i, 0)),
        ),
        compiler_params=pltpu.CompilerParams(
            dimension_semantics=("parallel",),
            vmem_limit_bytes=_VMEM_LIMIT),
    )(x_in, prep["g"], wt, prep["w_deq"])
    return out[:N] if n_pad != N else out


# ----------------------------- Attention kernel -----------------------------
def _attn_kernel(q_ref, k_ref, v_ref, sq_ref, cq_ref, sk_ref, ck_ref, msk_ref, o_ref,
                 m_sc, l_sc, acc_sc, qr_sc, *, hb, dh, scale):
    """One (batch, head-block, kv-block) step: fused CosSinRotary + flash attention.

    q_ref:  [L, hb*dh]   query columns of this head block (slice of the qkv tensor)
    k_ref:  [tk, hb*dh]  key columns of this kv block;  v_ref: [tk, hb*dh] value columns
    sq/cq:  [L, dh//2]   rotary tables (query rows);  sk/ck: [tk, dh//2] (this kv block)
    msk:    [L, 1]       query-row validity (torch: fully-masked query rows -> NaN)
    o_ref:  [L, hb*dh]   written on the last kv step, straight into [B, L, D] layout
    scratch: m/l [L, hb] f32, acc [L, hb*dh] f32, qr [L, hb*dh] bf16 (rotated+scaled q)
    """
    half = dh // 2
    kv = pl.program_id(2)
    nkv = pl.num_programs(2)

    def rotate(x, sin, cos):
        # CosSinRotary: [x1, x2] -> [x1*cos + x2*sin, x2*cos - x1*sin]
        # TODO(synk): a pltpu.roll-based rotate with a sign-baked [*, dh] table would
        # avoid the lane-dim slice/concat relayout for production dh.
        x1 = x[:, :half]
        x2 = x[:, half:]
        return jnp.concatenate([x1 * cos + x2 * sin, x2 * cos - x1 * sin], axis=-1)

    @pl.when(kv == 0)
    def _init():
        m_sc[...] = jnp.full(m_sc.shape, -jnp.inf, m_sc.dtype)
        l_sc[...] = jnp.zeros(l_sc.shape, l_sc.dtype)
        acc_sc[...] = jnp.zeros(acc_sc.shape, acc_sc.dtype)
        q = q_ref[...].astype(jnp.float32)
        sq = sq_ref[...]
        cq = cq_ref[...]
        for h in range(hb):                                   # static unroll over heads
            lo = h * dh
            qh = rotate(q[:, lo:lo + dh], sq, cq) * scale
            qr_sc[:, lo:lo + dh] = qh.astype(qr_sc.dtype)

    k = k_ref[...].astype(jnp.float32)
    sk = sk_ref[...]
    ck = ck_ref[...]
    for h in range(hb):
        lo = h * dh
        kh = rotate(k[:, lo:lo + dh], sk, ck).astype(jnp.bfloat16)          # [tk, dh]
        qh = qr_sc[:, lo:lo + dh]                                           # [L, dh] bf16
        # QK^T contracting the last dims (no K transpose materialized), f32 accumulate.
        s = jax.lax.dot_general(qh, kh, (((1,), (1,)), ((), ())),
                                preferred_element_type=jnp.float32)         # [L, tk]
        m_prev = m_sc[:, h:h + 1]
        m_new = jnp.maximum(m_prev, jnp.max(s, axis=-1, keepdims=True))
        alpha = jnp.exp(m_prev - m_new)
        p = jnp.exp(s - m_new)
        l_sc[:, h:h + 1] = alpha * l_sc[:, h:h + 1] + jnp.sum(p, axis=-1, keepdims=True)
        pv = jnp.dot(p.astype(jnp.bfloat16), v_ref[:, lo:lo + dh].astype(jnp.bfloat16),
                     preferred_element_type=jnp.float32)                    # [L, dh]
        acc_sc[:, lo:lo + dh] = alpha * acc_sc[:, lo:lo + dh] + pv
        m_sc[:, h:h + 1] = m_new

    @pl.when(kv == nkv - 1)
    def _finalize():
        valid = msk_ref[...] != 0.0                                         # [L, 1]
        for h in range(hb):
            lo = h * dh
            out_h = acc_sc[:, lo:lo + dh] / l_sc[:, h:h + 1]                # exact f32 divide
            out_h = jnp.where(valid, out_h, jnp.nan)                        # fused NaN rows
            o_ref[:, lo:lo + dh] = out_h.astype(o_ref.dtype)


def _pick_heads_per_block(H, dh, L):
    """Heads fused per grid step: the head-block lane width hb*dh must be a multiple of
    128 so the qkv column blocks stay (8,128)-tileable and output stores are lane-dense;
    capped by a per-generation VMEM budget so big L still fits on v7x."""
    best = 0
    for hb in range(1, H + 1):
        if H % hb != 0 or (hb * dh) % 128 != 0:
            continue
        too_big = (hb * dh > 512) or (12 * L * hb * dh > _VMEM_LIMIT // 4)
        if best and too_big:
            break
        best = hb
    if best == 0:
        # TODO(synk): add a [B, H, L, Dh]-layout fallback path for head dims where no
        # head block reaches a 128-lane multiple.
        raise NotImplementedError(
            f"no head-block lane width that is a multiple of 128 (H={H}, head_dim={dh})")
    return best


def _pick_kv_block(L):
    if L <= 512:
        return L
    for tk in range(512, 7, -8):      # largest multiple-of-8 divisor of L, <= 512
        if L % tk == 0:
            return tk
    return L


def attention(qkv, mask3, n_heads, dh, sin, cos, *, out_dtype=jnp.float32):
    """qkv: [B, L, 3*D] (head-major columns), mask3: [B, L, 1], sin/cos: [L, dh//2].
    Returns the attention output already in [B, L, D] layout (heads folded back)."""
    B, L, D3 = qkv.shape
    D = n_heads * dh
    assert D3 == 3 * D
    half = dh // 2
    hb = _pick_heads_per_block(n_heads, dh, L)
    nhb = n_heads // hb
    cw = hb * dh                                  # lane width of one head block (>=128)
    tk = _pick_kv_block(L)
    nkv = L // tk
    scale = 1.0 / math.sqrt(dh)

    # q / k / v are head-block COLUMN slices of the same [B, L, 3D] qkv tensor, so no
    # wrapper-side split / head-transpose HBM passes are needed.
    qspec = pl.BlockSpec((None, L, cw), lambda b, h, kv: (b, 0, h))
    kspec = pl.BlockSpec((None, tk, cw), lambda b, h, kv: (b, kv, nhb + h))
    vspec = pl.BlockSpec((None, tk, cw), lambda b, h, kv: (b, kv, 2 * nhb + h))
    rot_q_spec = pl.BlockSpec((L, half), lambda b, h, kv: (0, 0),
                              pipeline_mode=pl.Buffered(1))   # grid-invariant table
    rot_k_spec = pl.BlockSpec((tk, half), lambda b, h, kv: (kv, 0))
    mspec = pl.BlockSpec((None, L, 1), lambda b, h, kv: (b, 0, 0))
    ospec = pl.BlockSpec((None, L, cw), lambda b, h, kv: (b, 0, h))   # lane-dense store

    return pl.pallas_call(
        functools.partial(_attn_kernel, hb=hb, dh=dh, scale=scale),
        out_shape=jax.ShapeDtypeStruct((B, L, D), out_dtype),
        grid_spec=pltpu.PrefetchScalarGridSpec(
            num_scalar_prefetch=0,
            grid=(B, nhb, nkv),
            in_specs=[qspec, kspec, vspec, rot_q_spec, rot_q_spec,
                      rot_k_spec, rot_k_spec, mspec],
            out_specs=ospec,
            scratch_shapes=[
                pltpu.VMEM((L, hb), jnp.float32),     # running max
                pltpu.VMEM((L, hb), jnp.float32),     # running denominator
                pltpu.VMEM((L, cw), jnp.float32),     # output accumulator
                pltpu.VMEM((L, cw), jnp.bfloat16),    # rotated + scaled q (reused per kv)
            ],
        ),
        compiler_params=pltpu.CompilerParams(
            dimension_semantics=("parallel", "parallel", "arbitrary"),
            vmem_limit_bytes=_VMEM_LIMIT),
    )(qkv, qkv, qkv, sin, cos, sin, cos, mask3)


# ------------------------------- Full forward -------------------------------
def _rotary_tables(L, dh, base=10000.0):
    inv_freq = 1.0 / (base ** (jnp.arange(0, dh, 2, dtype=jnp.float32) / dh))
    freqs = jnp.arange(L, dtype=jnp.float32)[:, None] * inv_freq[None, :]
    return jnp.sin(freqs), jnp.cos(freqs)         # each [L, dh//2]


def prepare_params(params):
    """Weight-quant prep hoisted out of the per-forward path (done once per training step
    / once at load time for inference)."""
    return {
        "qkv": prepare_bitlinear(params["qkv_w"], params["qkv_g"]),
        "o": prepare_bitlinear(params["o_w"], params["o_g"]),
    }


def bitbert_self_attention(hidden, mask, prepped, n_heads, dropout_p=0.0):
    """hidden: [B, L, D] f32, mask: [B, L] (truthy = valid query row), returns [B, L, D]."""
    B, L, D = hidden.shape
    assert D % n_heads == 0
    dh = D // n_heads
    assert dh % 2 == 0
    x2d = hidden.reshape(B * L, D)
    # qkv stored bf16: q/k/v feed the bf16 MXU anyway; halves the [B, L, 3D] HBM traffic.
    qkv = bitlinear(x2d, prepped["qkv"], out_dtype=jnp.bfloat16).reshape(B, L, 3 * D)
    sin, cos = _rotary_tables(L, dh)
    mask3 = mask.astype(jnp.float32).reshape(B, L, 1)
    attn = attention(qkv, mask3, n_heads, dh, sin, cos, out_dtype=jnp.float32)  # [B, L, D]
    out2d = bitlinear(attn.reshape(B * L, D), prepped["o"], out_dtype=hidden.dtype)
    # F.dropout with dropout_p == 0.0 is identity.
    return out2d.reshape(B, L, D)


# ----------------------------- Pure-JAX reference ----------------------------
_HI = jax.lax.Precision.HIGHEST


def _ref_bitlinear(x, g, w):
    ms = jnp.mean(x * x, axis=-1, keepdims=True)
    xn = x * jax.lax.rsqrt(ms + 1e-6) * g
    s = 127.0 / jnp.maximum(jnp.max(jnp.abs(xn), axis=-1, keepdims=True), 1e-5)
    xq = jnp.clip(jnp.round(xn * s), -128.0, 127.0) / s
    ws = 1.0 / jnp.maximum(jnp.mean(jnp.abs(w)), 1e-5)
    wq = jnp.clip(jnp.round(w * ws), -1.0, 1.0) / ws
    return jnp.dot(xq, wq.T, precision=_HI)


def _reference(hidden, mask, params, n_heads):
    B, L, D = hidden.shape
    dh = D // n_heads
    half = dh // 2
    x2d = hidden.reshape(B * L, D)
    qkv = _ref_bitlinear(x2d, params["qkv_g"], params["qkv_w"]).reshape(B, L, 3 * D)
    xq, xk, xv = jnp.split(qkv, 3, axis=-1)
    q, k, v = (t.reshape(B, L, n_heads, dh) for t in (xq, xk, xv))
    sin, cos = _rotary_tables(L, dh)
    sin = sin[None, :, None, :]
    cos = cos[None, :, None, :]

    def rot(x):
        x1, x2 = x[..., :half], x[..., half:]
        return jnp.concatenate([x1 * cos + x2 * sin, -x1 * sin + x2 * cos], axis=-1)

    q, k = rot(q), rot(k)
    q, k, v = (t.transpose(0, 2, 1, 3) for t in (q, k, v))
    s = jnp.einsum("bhqd,bhkd->bhqk", q, k, precision=_HI) / jnp.sqrt(jnp.float32(dh))
    s = s + jnp.where(mask.astype(bool), 0.0, -jnp.inf)[:, None, :, None]
    p = jax.nn.softmax(s, axis=-1)
    o = jnp.einsum("bhqk,bhkd->bhqd", p, v, precision=_HI)
    o = o.transpose(0, 2, 1, 3).reshape(B * L, D)
    return _ref_bitlinear(o, params["o_g"], params["o_w"]).reshape(B, L, D)


if __name__ == "__main__":
    # Small but layout-realistic shapes: head_dim=128 keeps the head-block lane width a
    # multiple of 128 (required by the column-sliced qkv BlockSpecs).
    B, L, D, H = 2, 8, 256, 2
    key = jax.random.PRNGKey(0)
    k1, k2, k3 = jax.random.split(key, 3)
    hidden = jax.random.normal(k1, (B, L, D), jnp.float32)
    # all-valid mask (fully masked query rows produce NaN in torch SDPA too)
    mask = jnp.ones((B, L), jnp.int32)
    params = dict(
        # nn.init.trunc_normal_(std=0.002) ~= normal * 0.002 (trunc at +-2 never hits)
        qkv_w=jax.random.normal(k2, (3 * D, D), jnp.float32) * 0.002,
        qkv_g=jnp.ones((D,), jnp.float32),
        o_w=jax.random.normal(k3, (D, D), jnp.float32) * 0.002,
        o_g=jnp.ones((D,), jnp.float32),
    )
    prepped = prepare_params(params)

    out = jax.block_until_ready(bitbert_self_attention(hidden, mask, prepped, H))
    ref = jax.block_until_ready(_reference(hidden, mask, params, H))

    assert out.shape == (B, L, D), out.shape
    assert bool(jnp.all(jnp.isfinite(out)))
    err = float(jnp.max(jnp.abs(out - ref)))
    # bf16 MXU operands/probabilities + int8-absmax re-quantization of the o-proj input
    # give a few e-4 worst-case absolute error on this quantized pipeline.
    assert bool(jnp.allclose(out, ref, atol=2e-3, rtol=2e-2)), f"max abs err {err}"
    print("KERNEL_OK")
</pallas_src>

<mosaic_0001>
module attributes {stable_mosaic.version = 11 : i64} {
  func.func @_bitlinear_kernel(%arg0: i32, %arg1: memref<16x256xf32, #tpu.memory_space<vmem>>, %arg2: memref<1x256xf32, #tpu.memory_space<vmem>>, %arg3: memref<256x768xbf16, #tpu.memory_space<vmem>>, %arg4: memref<1xf32, #tpu.memory_space<smem>>, %arg5: memref<16x768xbf16, #tpu.memory_space<vmem>>) attributes {dimension_semantics = [#tpu.dimension_semantics<parallel>], iteration_bounds = array<i64: 1>, scalar_prefetch = 0 : i64, scratch_operands = 0 : i64, tpu.core_type = #tpu.core_type<tc>, window_params = [{transform_indices = @transform_0, window_bounds = array<i64: 16, 256>}, {pipeline_mode = #tpu.pipeline_mode<synchronous>, transform_indices = @transform_1, window_bounds = array<i64: 1, 256>}, {pipeline_mode = #tpu.pipeline_mode<synchronous>, transform_indices = @transform_2, window_bounds = array<i64: 256, 768>}, {transform_indices = @transform_3, window_bounds = array<i64: 1>}, {transform_indices = @transform_4, window_bounds = array<i64: 16, 768>}]} {
    %c0 = arith.constant 0 : index
    %c0_0 = arith.constant 0 : index
    %0 = vector.load %arg1[%c0, %c0_0] : memref<16x256xf32, #tpu.memory_space<vmem>>, vector<16x256xf32>
    %c0_1 = arith.constant 0 : index
    %c0_2 = arith.constant 0 : index
    %1 = vector.load %arg2[%c0_1, %c0_2] : memref<1x256xf32, #tpu.memory_space<vmem>>, vector<1x256xf32>
    %2 = arith.mulf %0, %0 : vector<16x256xf32>
    %cst = arith.constant dense<0.000000e+00> : vector<16xf32>
    %3 = vector.multi_reduction <add>, %2, %cst [1] : vector<16x256xf32> to vector<16xf32>
    %4 = vector.shape_cast %3 : vector<16xf32> to vector<16x1xf32>
    %cst_3 = arith.constant 2.560000e+02 : f32
    %5 = vector.broadcast %cst_3 : f32 to vector<16x1xf32>
    %6 = arith.divf %4, %5 : vector<16x1xf32>
    %cst_4 = arith.constant 9.99999997E-7 : f32
    %7 = vector.broadcast %cst_4 : f32 to vector<16x1xf32>
    %8 = arith.addf %6, %7 : vector<16x1xf32>
    %9 = math.rsqrt %8 : vector<16x1xf32>
    %10 = vector.broadcast %9 : vector<16x1xf32> to vector<16x256xf32>
    %11 = arith.mulf %0, %10 : vector<16x256xf32>
    %12 = vector.broadcast %1 : vector<1x256xf32> to vector<16x256xf32>
    %13 = arith.mulf %11, %12 : vector<16x256xf32>
    %14 = math.absf %13 : vector<16x256xf32>
    %cst_5 = arith.constant dense<0xFF800000> : vector<16xf32>
    %15 = vector.multi_reduction <maximumf>, %14, %cst_5 [1] : vector<16x256xf32> to vector<16xf32>
    %16 = vector.shape_cast %15 : vector<16xf32> to vector<16x1xf32>
    %cst_6 = arith.constant 9.99999974E-6 : f32
    %17 = vector.broadcast %cst_6 : f32 to vector<16x1xf32>
    %18 = arith.maximumf %16, %17 : vector<16x1xf32>
    %cst_7 = arith.constant 1.270000e+02 : f32
    %19 = vector.broadcast %cst_7 : f32 to vector<16x1xf32>
    %20 = arith.divf %19, %18 : vector<16x1xf32>
    %21 = vector.broadcast %20 : vector<16x1xf32> to vector<16x256xf32>
    %22 = arith.mulf %13, %21 : vector<16x256xf32>
    %23 = math.roundeven %22 : vector<16x256xf32>
    %cst_8 = arith.constant -1.280000e+02 : f32
    %cst_9 = arith.constant 1.270000e+02 : f32
    %24 = vector.broadcast %cst_8 : f32 to vector<16x256xf32>
    %25 = arith.maximumf %24, %23 : vector<16x256xf32>
    %26 = vector.broadcast %cst_9 : f32 to vector<16x256xf32>
    %27 = arith.minimumf %26, %25 : vector<16x256xf32>
    %28 = arith.truncf %27 : vector<16x256xf32> to vector<16x256xbf16>
    %c0_10 = arith.constant 0 : index
    %c0_11 = arith.constant 0 : index
    %29 = vector.load %arg3[%c0_10, %c0_11] : memref<256x768xbf16, #tpu.memory_space<vmem>>, vector<256x768xbf16>
    %cst_12 = arith.constant dense<0.000000e+00> : vector<16x768xf32>
    %30 = tpu.matmul %28, %29, %cst_12 {dimension_numbers = #tpu.dot_dimension_numbers<[1], [0], [0], [1], [0, 0, 1, 1], [], []>} : vector<16x256xbf16>, vector<256x768xbf16>, vector<16x768xf32> -> vector<16x768xf32>
    %c0_13 = arith.constant 0 : index
    %31 = memref.load %arg4[%c0_13] : memref<1xf32, #tpu.memory_space<smem>>
    %32 = vector.broadcast %31 : f32 to vector<16x1xf32>
    %33 = arith.mulf %18, %32 : vector<16x1xf32>
    %34 = vector.broadcast %33 : vector<16x1xf32> to vector<16x768xf32>
    %35 = arith.mulf %30, %34 : vector<16x768xf32>
    %36 = arith.truncf %35 : vector<16x768xf32> to vector<16x768xbf16>
    %c0_14 = arith.constant 0 : index
    %c0_15 = arith.constant 0 : index
    %37 = vector.load %arg5[%c0_14, %c0_15] : memref<16x768xbf16, #tpu.memory_space<vmem>>, vector<16x768xbf16>
    tpu.vector_store %arg5[%c0_14, %c0_15], %36 {strides = array<i32>} : memref<16x768xbf16, #tpu.memory_space<vmem>>, vector<16x768xbf16>,
    return
  }
  func.func @transform_0(%arg0: i32) -> (i32, i32) {
    %c0_i32 = arith.constant 0 : i32
    %c0_i32_0 = arith.constant 0 : i32
    return %arg0, %c0_i32 : i32, i32
  }
  func.func @transform_1(%arg0: i32) -> (i32, i32) {
    %c0_i32 = arith.constant 0 : i32
    %c0_i32_0 = arith.constant 0 : i32
    %c0_i32_1 = arith.constant 0 : i32
    return %c0_i32, %c0_i32_0 : i32, i32
  }
  func.func @transform_2(%arg0: i32) -> (i32, i32) {
    %c0_i32 = arith.constant 0 : i32
    %c0_i32_0 = arith.constant 0 : i32
    %c0_i32_1 = arith.constant 0 : i32
    return %c0_i32, %c0_i32_0 : i32, i32
  }
  func.func @transform_3(%arg0: i32) -> i32 {
    %c0_i32 = arith.constant 0 : i32
    %c0_i32_0 = arith.constant 0 : i32
    return %c0_i32 : i32
  }
  func.func @transform_4(%arg0: i32) -> (i32, i32) {
    %c0_i32 = arith.constant 0 : i32
    %c0_i32_0 = arith.constant 0 : i32
    return %arg0, %c0_i32 : i32, i32
  }
}

</mosaic_0001>

<bundles_post_ra>
// kernel: tpu_custom_call.1
= control target key start
LH: loop header
LB: loop body
LE: loop exit
PB: predicated region body
PF: predicated region fallthrough
CT: control target
= control target key end

     0   :  { %10 = vsyncpa [#allocation4], 0  ;;  %s1432_s0 = inlined_call_operand.hbm [shape: f32[16,256], index: 0, kind: input, shape index: {}]   ;;  %s1433_s1 = inlined_call_operand.hbm [shape: f32[1,256], index: 1, kind: input, shape index: {}]   ;;  %s1434_s2 = inlined_call_operand.hbm [shape: bf16[256,768], index: 2, kind: input, shape index: {}]   ;;  %s1435_s3 = inlined_call_operand.<no memory space> [shape: f32[1], index: 3, kind: input, shape index: {}]   ;;  %s1436_s4 = inlined_call_operand.hbm [shape: bf16[16,768], index: 4, kind: output, shape index: {}]  }
   0x1   :  { %11 = vsyncpa [#allocation7], 0 }
   0x2   :  { %12 = vsyncpa [#allocation5], 0  ;;  %s1280_s15 = smov [#allocation6]   ;;  %s1281_s17 = smov [#allocation3]  }
   0x3   :  { %s31_s16 = sshll.u32 %s1280_s15, 4  ;;  %s18_s18 = sshll.u32 %s1281_s17, 4  ;;  %s32_s16 = int_to_ptr.vmem [resolvable:$true] %s31_s16  ;;  %s1313_s18 = int_to_ptr.vmem [resolvable:$true] %s18_s18 }
   0x4   :  { %s1186_s21 = scalar_lea.hbm %s1433_s1, 32 }
   0x5   :  { %p1187_p0 = scmp.ne.s32.totalorder %s1433_s1, %s1186_s21  ;;  %p1190_p1 = scmp.lt.u32.totalorder %s1186_s21, %s1433_s1 }
   0x7   :  { %p1192_p2 = pnand %p1190_p1, %p1187_p0 }
   0x9   :  { %1195 = shalt.err (!%p1192_p2)
}
   0xa   :  { %s1196_s26 = scalar_lea.vmem %s32_s16, 32  ;;  %p1201_p4 = scmp.lt.s32.totalorder %s32_s16, %s32_s16 }
   0xb   :  { %p1197_p3 = scmp.ne.s32.totalorder %s32_s16, %s1196_s26  ;;  %p1202_p5 = scmp.lt.s32.totalorder %s1196_s26, %s1196_s26 }
   0xd   :  { %p1203_p6 = por %p1202_p5, %p1201_p4 }
   0xf   :  { %p1204_p7 = pnand %p1203_p6, %p1197_p3 }
  0x11   :  { %1207 = shalt.err (!%p1204_p7)
}
  0x12   :  { %34 = dma.hbm_to_vmem [thread:$0]  %s1433_s1, 32, %s32_s16, [#allocation7]  }
  0x13   :  { %s1208_s5 = scalar_lea.hbm %s1432_s0, 512 }
  0x14   :  { %p1209_p8 = scmp.ne.s32.totalorder %s1432_s0, %s1208_s5  ;;  %p1212_p9 = scmp.lt.u32.totalorder %s1208_s5, %s1432_s0 }
  0x16   :  { %p1214_p10 = pnand %p1212_p9, %p1209_p8 }
  0x18   :  { %1217 = shalt.err (!%p1214_p10)
}
  0x19   :  { %s1218_s10 = scalar_lea.vmem %s1313_s18, 512  ;;  %p1223_p12 = scmp.lt.s32.totalorder %s1313_s18, %s1313_s18 }
  0x1a   :  { %p1219_p11 = scmp.ne.s32.totalorder %s1313_s18, %s1218_s10  ;;  %p1224_p13 = scmp.lt.s32.totalorder %s1218_s10, %s1218_s10 }
  0x1c   :  { %p1225_p0 = por %p1224_p13, %p1223_p12 }
  0x1e   :  { %p1226_p1 = pnand %p1225_p0, %p1219_p11 }
  0x20   :  { %1229 = shalt.err (!%p1226_p1)
}
  0x21   :  { %s1282_s1 = smov 256   ;;  %s1283_s11 = smov 16  }
  0x22   :  { %24 = dma.hbm_to_vmem [thread:$0]  %s1432_s0, 512, %s1313_s18, [#allocation4], %s1282_s1, %s1282_s1, %s1283_s11  }
  0x23   :  { %s1284_s14 = smov [#allocation8]   ;;  %s1230_s19 = scalar_lea.hbm %s1434_s2, 12288 }
  0x24   :  { %s40_s15 = sshll.u32 %s1284_s14, 4  ;;  %p1231_p2 = scmp.ne.s32.totalorder %s1434_s2, %s1230_s19  ;;  %s41_s15 = int_to_ptr.vmem [resolvable:$true] %s40_s15 }
  0x25   :  { %p1234_p3 = scmp.lt.u32.totalorder %s1230_s19, %s1434_s2 }
  0x27   :  { %p1236_p4 = pnand %p1234_p3, %p1231_p2 }
  0x29   :  { %1239 = shalt.err (!%p1236_p4)
}
  0x2a   :  { %s1240_s24 = scalar_lea.vmem %s41_s15, 12288  ;;  %p1245_p6 = scmp.lt.s32.totalorder %s41_s15, %s41_s15 }
  0x2b   :  { %p1241_p5 = scmp.ne.s32.totalorder %s41_s15, %s1240_s24  ;;  %p1246_p7 = scmp.lt.s32.totalorder %s1240_s24, %s1240_s24 }
  0x2d   :  { %p1247_p8 = por %p1246_p7, %p1245_p6 }
  0x2f   :  { %p1248_p9 = pnand %p1247_p8, %p1241_p5 }
  0x31   :  { %1251 = shalt.err (!%p1248_p9)
}
  0x32   :  { %s1285_s0 = smov 384   ;;  %s1286_s18 = smov 24  }
  0x33   :  { %46 = dma.hbm_to_vmem [thread:$0]  %s1434_s2, 12288, %s41_s15, [#allocation7], %s1285_s0, %s1285_s0, %s1286_s18  }
  0x34   :  { %1274 = dma.done.wait [#allocation4], 512  }
  0x35   :  { %1275 = vsyncadd [#allocation4], 4294966784 }
  0x36   :  { %1276 = dma.done.wait [#allocation7], 12320  }
  0x37   :  { %1277 = vsyncadd [#allocation7], 4294954976  ;;  %v1359_v0 = vld [vmem:[#allocation3] sm:$0xff]  ;;  %v1361_v1 = vld [vmem:[#allocation3 + $0x8] sm:$0xff]  ;;  %v85_v48 = vlaneseq }
  0x38   :  { %v1363_v2 = vld [vmem:[#allocation3 + $0x10] sm:$0xff]  ;;  %v63_v3 = vmul.f32 %v1359_v0, %v1359_v0  ;;  %v64_v4 = vmul.f32 %v1361_v1, %v1361_v1  ;;  %v1369_v5 = vld [vmem:[#allocation3 + $0x18] sm:$0xff]  ;;  %v1039_v13 = vld [vmem:[#allocation8 + $0x8] ss:$24 sps:$4 sm:$0xff]  }
  0x39   :  { %v65_v6 = vmul.f32 %v1363_v2, %v1363_v2  ;;  %v66_v7 = vmul.f32 %v1369_v5, %v1369_v5  ;;  %v1034_v10 = vld [vmem:[#allocation8 + $0x4] ss:$24 sps:$4 sm:$0xff]   ;;  %v1036_v11 = vld [vmem:[#allocation8] ss:$24 sps:$4 sm:$0xff]   ;;  %v1040_v14 = vld [vmem:[#allocation8 + $0x34] ss:$24 sps:$4 sm:$0xff]  }
  0x3a   :  { %v67_v8 = vadd.f32 %v64_v4, %v63_v3  ;;  %v1037_v12 = vld [vmem:[#allocation8 + $0xc] ss:$24 sps:$4 sm:$0xff]   ;;  %709 = vmatprep.subr.bf16.mxu0 %v1034_v10  ;;  %v1043_v15 = vld [vmem:[#allocation8 + $0x3c] ss:$24 sps:$4 sm:$0xff]   ;;  %v1042_v16 = vld [vmem:[#allocation8 + $0x30] ss:$24 sps:$4 sm:$0xff]  }
  0x3b   :  { %v70_v9 = vadd.f32 %v66_v7, %v65_v6  ;;  %752 = vmatprep.subr.bf16.mxu1 %v1037_v12  ;;  %710 = vmatpush1.bf16.msra.mxu0 %v1036_v11  ;;  %v1045_v17 = vld [vmem:[#allocation8 + $0x38] ss:$24 sps:$4 sm:$0xff]   ;;  %v1046_v18 = vld [vmem:[#allocation8 + $0x64] ss:$24 sps:$4 sm:$0xff]   ;;  %v1051_v21 = vld [vmem:[#allocation8 + $0x68] ss:$24 sps:$4 sm:$0xff]  }
  0x3c   :  { %68 = vadd.xlane.f32.xlu0 %v67_v8  ;;  %753 = vmatpush1.bf16.msra.mxu1 %v1039_v13  ;;  %v1049_v19 = vld [vmem:[#allocation8 + $0x6c] ss:$24 sps:$4 sm:$0xff]   ;;  %v1048_v20 = vld [vmem:[#allocation8 + $0x60] ss:$24 sps:$4 sm:$0xff]   ;;  %v1055_v23 = vld [vmem:[#allocation8 + $0x9c] ss:$24 sps:$4 sm:$0xff]  }
  0x3d   :  { %711 = vmatprep.subr.bf16.mxu0 %v1040_v14  ;;  %754 = vmatprep.subr.bf16.mxu1 %v1043_v15  ;;  %v1052_v22 = vld [vmem:[#allocation8 + $0x94] ss:$24 sps:$4 sm:$0xff]   ;;  %v1054_v24 = vld [vmem:[#allocation8 + $0x90] ss:$24 sps:$4 sm:$0xff]   ;;  %v1058_v26 = vld [vmem:[#allocation8 + $0xc4] ss:$24 sps:$4 sm:$0xff]  }
  0x3e   :  { %v1057_v25 = vld [vmem:[#allocation8 + $0x98] ss:$24 sps:$4 sm:$0xff]   ;;  %v1061_v27 = vld [vmem:[#allocation8 + $0xcc] ss:$24 sps:$4 sm:$0xff]   ;;  %v1063_v29 = vld [vmem:[#allocation8 + $0xc8] ss:$24 sps:$4 sm:$0xff]  }
  0x3f   :  { %712 = vmatpush1.bf16.msra.mxu0 %v1042_v16  ;;  %v1060_v28 = vld [vmem:[#allocation8 + $0xc0] ss:$24 sps:$4 sm:$0xff]   ;;  %v1064_v30 = vld [vmem:[#allocation8 + $0xf4] ss:$24 sps:$4 sm:$0xff]   ;;  %v1066_v32 = vld [vmem:[#allocation8 + $0xf0] ss:$24 sps:$4 sm:$0xff]  }
  0x40   :  { %71 = vadd.xlane.f32.xlu0 %v70_v9  ;;  %755 = vmatpush1.bf16.msra.mxu1 %v1045_v17  ;;  %v1067_v31 = vld [vmem:[#allocation8 + $0xfc] ss:$24 sps:$4 sm:$0xff]   ;;  %v1069_v33 = vld [vmem:[#allocation8 + $0xf8] ss:$24 sps:$4 sm:$0xff]   ;;  %v1073_v35 = vld [vmem:[#allocation8 + $0x12c] ss:$24 sps:$4 sm:$0xff]  }
  0x41   :  { %713 = vmatprep.subr.bf16.mxu0 %v1046_v18  ;;  %756 = vmatprep.subr.bf16.mxu1 %v1049_v19  ;;  %v1070_v34 = vld [vmem:[#allocation8 + $0x124] ss:$24 sps:$4 sm:$0xff]   ;;  %v1072_v36 = vld [vmem:[#allocation8 + $0x120] ss:$24 sps:$4 sm:$0xff]   ;;  %v1076_v38 = vld [vmem:[#allocation8 + $0x154] ss:$24 sps:$4 sm:$0xff]  }
  0x42   :  { %v1075_v37 = vld [vmem:[#allocation8 + $0x128] ss:$24 sps:$4 sm:$0xff]   ;;  %v1079_v39 = vld [vmem:[#allocation8 + $0x15c] ss:$24 sps:$4 sm:$0xff]   ;;  %v1081_v41 = vld [vmem:[#allocation8 + $0x158] ss:$24 sps:$4 sm:$0xff]  }
  0x43   :  { %714 = vmatpush1.bf16.msra.mxu0 %v1048_v20  ;;  %v1078_v40 = vld [vmem:[#allocation8 + $0x150] ss:$24 sps:$4 sm:$0xff]   ;;  %v1082_v42 = vld [vmem:[#allocation8 + $0x184] ss:$24 sps:$4 sm:$0xff]   ;;  %v1084_v44 = vld [vmem:[#allocation8 + $0x180] ss:$24 sps:$4 sm:$0xff]  }
  0x44   :  { %757 = vmatpush1.bf16.msra.mxu1 %v1051_v21  ;;  %715 = vmatprep.subr.bf16.mxu0 %v1052_v22  ;;  %v1085_v43 = vld [vmem:[#allocation8 + $0x18c] ss:$24 sps:$4 sm:$0xff]   ;;  %v1087_v45 = vld [vmem:[#allocation8 + $0x188] ss:$24 sps:$4 sm:$0xff]   ;;  %v86_v52 = vshrl.u32 %v85_v48, 7 }
  0x45   :  { %758 = vmatprep.subr.bf16.mxu1 %v1055_v23  ;;  %v62_v56 = vld [vmem:[#allocation6] sm:$0x3]  ;;  %v1088_v13 = vld [vmem:[#allocation8 + $0x1b4] ss:$24 sps:$4 sm:$0xff]   ;;  %v1090_v14 = vld [vmem:[#allocation8 + $0x1b0] ss:$24 sps:$4 sm:$0xff]  }
  0x46   :  { %v87_v54 = vsub.s32 0, %v86_v52  ;;  %v91_v55 = vsub.s32 1, %v86_v52  ;;  %v1091_v15 = vld [vmem:[#allocation8 + $0x1bc] ss:$24 sps:$4 sm:$0xff]   ;;  %v1093_v16 = vld [vmem:[#allocation8 + $0x1b8] ss:$24 sps:$4 sm:$0xff]  }
  0x47   :  { %716 = vmatpush1.bf16.msra.mxu0 %v1054_v24  ;;  %v1097_v17 = vld [vmem:[#allocation8 + $0x1ec] ss:$24 sps:$4 sm:$0xff]   ;;  %v1099_v18 = vld [vmem:[#allocation8 + $0x1e8] ss:$24 sps:$4 sm:$0xff]   ;;  %v1103_v21 = vld [vmem:[#allocation8 + $0x21c] ss:$24 sps:$4 sm:$0xff]  }
  0x48   :  { %759 = vmatpush1.bf16.msra.mxu1 %v1057_v25  ;;  %717 = vmatprep.subr.bf16.mxu0 %v1058_v26  ;;  %v88_v57 = vrot.slane %v62_v56, %v87_v54  ;;  %v92_v58 = vrot.slane %v62_v56, %v91_v55  ;;  %v1100_v19 = vld [vmem:[#allocation8 + $0x214] ss:$24 sps:$4 sm:$0xff]   ;;  %v1102_v20 = vld [vmem:[#allocation8 + $0x210] ss:$24 sps:$4 sm:$0xff]   ;;  %v1106_v23 = vld [vmem:[#allocation8 + $0x244] ss:$24 sps:$4 sm:$0xff]  }
  0x49   :  { %760 = vmatprep.subr.bf16.mxu1 %v1061_v27  ;;  %v1105_v22 = vld [vmem:[#allocation8 + $0x218] ss:$24 sps:$4 sm:$0xff]   ;;  %v1109_v25 = vld [vmem:[#allocation8 + $0x24c] ss:$24 sps:$4 sm:$0xff]   ;;  %v1111_v26 = vld [vmem:[#allocation8 + $0x248] ss:$24 sps:$4 sm:$0xff]  }
  0x4a   :  { %v1108_v24 = vld [vmem:[#allocation8 + $0x240] ss:$24 sps:$4 sm:$0xff]   ;;  %v1112_v27 = vld [vmem:[#allocation8 + $0x274] ss:$24 sps:$4 sm:$0xff]  }
  0x4b   :  { %718 = vmatpush1.bf16.msra.mxu0 %v1060_v28  ;;  %v1114_v28 = vld [vmem:[#allocation8 + $0x270] ss:$24 sps:$4 sm:$0xff]  }
  0x4c   :  { %761 = vmatpush1.bf16.msra.mxu1 %v1063_v29  ;;  %719 = vmatprep.subr.bf16.mxu0 %v1064_v30  ;;  %v1115_v29 = vld [vmem:[#allocation8 + $0x27c] ss:$24 sps:$4 sm:$0xff]   ;;  %v1117_v30 = vld [vmem:[#allocation8 + $0x278] ss:$24 sps:$4 sm:$0xff]  }
  0x4d   :  { %762 = vmatprep.subr.bf16.mxu1 %v1067_v31  ;;  %v1118_v31 = vld [vmem:[#allocation8 + $0x2a4] ss:$24 sps:$4 sm:$0xff]  }
  0x4f   :  { %720 = vmatpush1.bf16.msra.mxu0 %v1066_v32  ;;  %v1120_v32 = vld [vmem:[#allocation8 + $0x2a0] ss:$24 sps:$4 sm:$0xff]  }
  0x50   :  { %763 = vmatpush1.bf16.msra.mxu1 %v1069_v33  ;;  %721 = vmatprep.subr.bf16.mxu0 %v1070_v34  ;;  %v1121_v33 = vld [vmem:[#allocation8 + $0x2ac] ss:$24 sps:$4 sm:$0xff]   ;;  %v1123_v34 = vld [vmem:[#allocation8 + $0x2a8] ss:$24 sps:$4 sm:$0xff]  }
  0x51   :  { %764 = vmatprep.subr.bf16.mxu1 %v1073_v35  ;;  %v1124_v35 = vld [vmem:[#allocation8 + $0x2d4] ss:$24 sps:$4 sm:$0xff]  }
  0x53   :  { %722 = vmatpush1.bf16.msra.mxu0 %v1072_v36  ;;  %v1127_v36 = vld [vmem:[#allocation8 + $0x2dc] ss:$24 sps:$4 sm:$0xff]  }
  0x54   :  { %765 = vmatpush1.bf16.msra.mxu1 %v1075_v37  ;;  %723 = vmatprep.subr.bf16.mxu0 %v1076_v38  ;;  %v1126_v37 = vld [vmem:[#allocation8 + $0x2d0] ss:$24 sps:$4 sm:$0xff]  }
  0x55   :  { %766 = vmatprep.subr.bf16.mxu1 %v1079_v39  ;;  %v1129_v38 = vld [vmem:[#allocation8 + $0x2d8] ss:$24 sps:$4 sm:$0xff]   ;;  %v1132_v39 = vld [vmem:[#allocation8 + $0x14] ss:$24 sps:$4 sm:$0xff]  }
  0x57   :  { %724 = vmatpush1.bf16.msra.mxu0 %v1078_v40 }
  0x58   :  { %767 = vmatpush1.bf16.msra.mxu1 %v1081_v41  ;;  %725 = vmatprep.subr.bf16.mxu0 %v1082_v42 }
  0x59   :  { %768 = vmatprep.subr.bf16.mxu1 %v1085_v43 }
  0x5b   :  { %726 = vmatpush1.bf16.msra.mxu0 %v1084_v44 }
  0x5c   :  { %769 = vmatpush1.bf16.msra.mxu1 %v1087_v45  ;;  %727 = vmatprep.subr.bf16.mxu0 %v1088_v13  ;;  %v1147_v13 = vld [vmem:[#allocation8 + $0x104] ss:$24 sps:$4 sm:$0xff]  }
  0x5d   :  { %770 = vmatprep.subr.bf16.mxu1 %v1091_v15  ;;  %v1150_v15 = vld [vmem:[#allocation8 + $0x134] ss:$24 sps:$4 sm:$0xff]  }
  0x5f   :  { %728 = vmatpush1.bf16.msra.mxu0 %v1090_v14  ;;  %v1145_v14 = vld [vmem:[#allocation8 + $0x100] ss:$24 sps:$4 sm:$0xff]  }
  0x60   :  { %771 = vmatpush1.bf16.msra.mxu1 %v1093_v16  ;;  %v1148_v16 = vld [vmem:[#allocation8 + $0x130] ss:$24 sps:$4 sm:$0xff]  }
  0x61   :  { %772 = vmatprep.subr.bf16.mxu1 %v1097_v17  ;;  %v1156_v17 = vld [vmem:[#allocation8 + $0x194] ss:$24 sps:$4 sm:$0xff]  }
  0x64   :  { %773 = vmatpush1.bf16.msra.mxu1 %v1099_v18  ;;  %v1154_v18 = vld [vmem:[#allocation8 + $0x190] ss:$24 sps:$4 sm:$0xff]  }
  0x65   :  { %774 = vmatprep.subr.bf16.mxu1 %v1103_v21  ;;  %v1162_v21 = vld [vmem:[#allocation8 + $0x1f4] ss:$24 sps:$4 sm:$0xff]  }
  0x68   :  { %775 = vmatpush1.bf16.msra.mxu1 %v1105_v22  ;;  %v1160_v22 = vld [vmem:[#allocation8 + $0x1f0] ss:$24 sps:$4 sm:$0xff]  }
  0x69   :  { %776 = vmatprep.subr.bf16.mxu1 %v1109_v25  ;;  %v1168_v25 = vld [vmem:[#allocation8 + $0x254] ss:$24 sps:$4 sm:$0xff]  }
  0x6c   :  { %777 = vmatpush1.bf16.msra.mxu1 %v1111_v26  ;;  %v1166_v26 = vld [vmem:[#allocation8 + $0x250] ss:$24 sps:$4 sm:$0xff]  }
  0x6d   :  { %778 = vmatprep.subr.bf16.mxu1 %v1115_v29  ;;  %v1174_v29 = vld [vmem:[#allocation8 + $0x2b4] ss:$24 sps:$4 sm:$0xff]  }
  0x70   :  { %779 = vmatpush1.bf16.msra.mxu1 %v1117_v30  ;;  %v1172_v30 = vld [vmem:[#allocation8 + $0x2b0] ss:$24 sps:$4 sm:$0xff]  }
  0x71   :  { %780 = vmatprep.subr.bf16.mxu1 %v1121_v33  ;;  %v839_v33 = vstv %s1435_s3  ;;  %s1287_s3 = smov [#allocation9]  }
  0x72   :  { %s901_s28 = sshll.u32 %s1287_s3, 4  ;;  %s902_s28 = int_to_ptr.vmem [resolvable:$true] %s901_s28 }
  0x73   :  { %s1252_s29 = scalar_lea.vmem %s902_s28, 768  ;;  %p1257_p11 = scmp.lt.s32.totalorder %s902_s28, %s902_s28 }
  0x74   :  { %781 = vmatpush1.bf16.msra.mxu1 %v1123_v34  ;;  %p1253_p10 = scmp.ne.s32.totalorder %s902_s28, %s1252_s29  ;;  %p1258_p12 = scmp.lt.s32.totalorder %s1252_s29, %s1252_s29 }
  0x75   :  { %782 = vmatprep.subr.bf16.mxu1 %v1127_v36 }
  0x76   :  { %p1259_p13 = por %p1258_p12, %p1257_p11 }
  0x78   :  { %783 = vmatpush1.bf16.msra.mxu1 %v1129_v38  ;;  %p1260_p0 = pnand %p1259_p13, %p1253_p10 }
  0xc9   :  { %v69_v46 = vpop.xlane.xlu0 %68 }
  0xca   :  { %v74_v47 = vmul.f32 0.00390625, %v69_v46 }
  0xcc   :  { %v76_v49 = vadd.f32 1e-06, %v74_v47 }
  0xcd   :  { %v72_v50 = vpop.xlane.xlu0 %71 }
  0xce   :  { %1178 = vrsqrt.f32 %v76_v49  ;;  %v75_v51 = vmul.f32 0.00390625, %v72_v50 }
  0xd0   :  { %v77_v53 = vadd.f32 1e-06, %v75_v51 }
  0xd2   :  { %1180 = vrsqrt.f32 %v77_v53 }
  0xd8   :  { %v1179_v59 = vpop.eup %1178 }
  0xd9   :  { %v80_v60 = vmul.f32 %v1179_v59, %v1359_v0  ;;  %v81_v61 = vmul.f32 %v1179_v59, %v1361_v1 }
  0xdb   :  { %v1377_v62 = vmul.f32 %v88_v57, %v80_v60  ;;  %v1379_v63 = vmul.f32 %v92_v58, %v81_v61 }
  0xdc   :  { %v1181_v3 = vpop.eup %1180 }
  0xdd   :  { %v99_v4 = vand.u32 2147483647, %v1377_v62  ;;  %v100_v6 = vand.u32 2147483647, %v1379_v63  ;;  %v82_v7 = vmul.f32 %v1181_v3, %v1363_v2  ;;  %v83_v8 = vmul.f32 %v1181_v3, %v1369_v5  ;;  %v1094_v2 = vld [vmem:[#allocation8 + $0x1e4] ss:$24 sps:$4 sm:$0xff]  }
  0xde   :  { %v1096_v5 = vld [vmem:[#allocation8 + $0x1e0] ss:$24 sps:$4 sm:$0xff]   ;;  %729 = vmatprep.subr.bf16.mxu0 %v1094_v2  ;;  %v1153_v2 = vld [vmem:[#allocation8 + $0x164] ss:$24 sps:$4 sm:$0xff]  }
  0xdf   :  { %v103_v9 = vmax.f32.f32 %v99_v4, %v100_v6  ;;  %v1385_v10 = vmul.f32 %v88_v57, %v82_v7  ;;  %v1387_v11 = vmul.f32 %v92_v58, %v83_v8  ;;  %730 = vmatpush1.bf16.msra.mxu0 %v1096_v5  ;;  %v1135_v7 = vld [vmem:[#allocation8 + $0x44] ss:$24 sps:$4 sm:$0xff]   ;;  %v1133_v8 = vld [vmem:[#allocation8 + $0x40] ss:$24 sps:$4 sm:$0xff]  }
  0xe0   :  { %731 = vmatprep.subr.bf16.mxu0 %v1100_v19  ;;  %v1151_v5 = vld [vmem:[#allocation8 + $0x160] ss:$24 sps:$4 sm:$0xff]   ;;  %v1159_v19 = vld [vmem:[#allocation8 + $0x1c4] ss:$24 sps:$4 sm:$0xff]  }
  0xe1   :  { %104 = vmax.xlane.f32.xlu1 %v103_v9  ;;  %v101_v0 = vand.u32 2147483647, %v1385_v10  ;;  %v102_v1 = vand.u32 2147483647, %v1387_v11  ;;  %v1138_v9 = vld [vmem:[#allocation8 + $0x74] ss:$24 sps:$4 sm:$0xff]  }
  0xe3   :  { %v106_v12 = vmax.f32.f32 %v101_v0, %v102_v1  ;;  %732 = vmatpush1.bf16.msra.mxu0 %v1102_v20  ;;  %v1139_v0 = vld [vmem:[#allocation8 + $0xa0] ss:$24 sps:$4 sm:$0xff]   ;;  %v1144_v1 = vld [vmem:[#allocation8 + $0xd4] ss:$24 sps:$4 sm:$0xff]  }
  0xe4   :  { %733 = vmatprep.subr.bf16.mxu0 %v1106_v23  ;;  %v1157_v20 = vld [vmem:[#allocation8 + $0x1c0] ss:$24 sps:$4 sm:$0xff]   ;;  %v1165_v23 = vld [vmem:[#allocation8 + $0x224] ss:$24 sps:$4 sm:$0xff]  }
  0xe5   :  { %107 = vmax.xlane.f32.xlu1 %v106_v12  ;;  %v1142_v12 = vld [vmem:[#allocation8 + $0xd0] ss:$24 sps:$4 sm:$0xff]  }
  0xe7   :  { %734 = vmatpush1.bf16.msra.mxu0 %v1108_v24  ;;  %v1163_v24 = vld [vmem:[#allocation8 + $0x220] ss:$24 sps:$4 sm:$0xff]  }
  0xe8   :  { %735 = vmatprep.subr.bf16.mxu0 %v1112_v27  ;;  %v1171_v27 = vld [vmem:[#allocation8 + $0x284] ss:$24 sps:$4 sm:$0xff]  }
  0xeb   :  { %736 = vmatpush1.bf16.msra.mxu0 %v1114_v28  ;;  %v1169_v28 = vld [vmem:[#allocation8 + $0x280] ss:$24 sps:$4 sm:$0xff]  }
  0xec   :  { %737 = vmatprep.subr.bf16.mxu0 %v1118_v31  ;;  %v1177_v31 = vld [vmem:[#allocation8 + $0x2e4] ss:$24 sps:$4 sm:$0xff]  }
  0xef   :  { %738 = vmatpush1.bf16.msra.mxu0 %v1120_v32  ;;  %v1175_v32 = vld [vmem:[#allocation8 + $0x2e0] ss:$24 sps:$4 sm:$0xff]  }
  0xf0   :  { %739 = vmatprep.subr.bf16.mxu0 %v1124_v35 }
  0xf3   :  { %740 = vmatpush1.bf16.msra.mxu0 %v1126_v37 }
  0xf4   :  { %795 = vmatprep.subr.bf16.mxu0 %v1132_v39 }
 0x16e   :  { %v1391_v40 = vpop.xlane.xlu1 %104 }
 0x16f   :  { %v109_v41 = vmax.f32 %v1391_v40, 1e-05 }
 0x171   :  { %1182 = vrcp.f32 %v109_v41  ;;  %v840_v34 = vmul.f32 %v839_v33, %v109_v41 }
 0x172   :  { %v1396_v42 = vpop.xlane.xlu1 %107 }
 0x173   :  { %v110_v43 = vmax.f32 %v1396_v42, 1e-05 }
 0x175   :  { %1184 = vrcp.f32 %v110_v43  ;;  %v841_v37 = vmul.f32 %v839_v33, %v110_v43 }
 0x17b   :  { %v1183_v44 = vpop.eup %1182 }
 0x17c   :  { %v112_v45 = vmul.f32 127.0, %v1183_v44 }
 0x17e   :  { %v115_v46 = vmul.f32 %v112_v45, %v1377_v62  ;;  %v116_v47 = vmul.f32 %v112_v45, %v1379_v63  ;;  %v1130_v63 = vld [vmem:[#allocation8 + $0x10] ss:$24 sps:$4 sm:$0xff]  }
 0x17f   :  { %v1185_v48 = vpop.eup %1184 }
 0x180   :  { %v114_v49 = vmul.f32 127.0, %v1185_v48  ;;  %v1023_v50 = vround.rtne.f32 %v116_v47  ;;  %v1022_v51 = vround.rtne.f32 %v115_v46 }
 0x182   :  { %v117_v52 = vmul.f32 %v114_v49, %v1385_v10  ;;  %v118_v53 = vmul.f32 %v114_v49, %v1387_v11  ;;  %v124_v55 = vmax.f32 %v1023_v50, -128.0  ;;  %v123_v57 = vmax.f32 %v1022_v51, -128.0  ;;  %v1136_v10 = vld [vmem:[#allocation8 + $0x70] ss:$24 sps:$4 sm:$0xff]   ;;  %v1141_v11 = vld [vmem:[#allocation8 + $0xa4] ss:$24 sps:$4 sm:$0xff]  }
 0x184   :  { %v1025_v54 = vround.rtne.f32 %v118_v53  ;;  %v1024_v56 = vround.rtne.f32 %v117_v52  ;;  %v128_v60 = vmin.f32 %v124_v55, 127.0  ;;  %v127_v3 = vmin.f32 %v123_v57, 127.0 }
 0x186   :  { %v126_v58 = vmax.f32 %v1025_v54, -128.0  ;;  %v125_v59 = vmax.f32 %v1024_v56, -128.0 }
 0x188   :  { %v130_v61 = vmin.f32 %v126_v58, 127.0  ;;  %v129_v62 = vmin.f32 %v125_v59, 127.0 }
 0x18a   :  { %v132_v4 = vpack.c.bf16 %v130_v61, %v128_v60  ;;  %v1405_v6 = vpack.c.bf16 %v129_v62, %v127_v3 }
 0x18c   :  { %741 = vmatprep.mubr.bf16.mxu0 %v132_v4  ;;  %784 = vmatprep.mubr.bf16.mxu1 %v132_v4 }
 0x18d   :  { %742 = vmatmul.mubr.bf16.vlgmr.msra.gmra.mrb[0].mxu0 %v1405_v6  ;;  %785 = vmatmul.mubr.bf16.vlgmr.msra.gmra.mrb[0].mxu1 %v1405_v6 }
 0x18e   :  { %796 = vmatpush1.bf16.msra.mxu0 %v1130_v63  ;;  %827 = vmatprep.mubr.bf16.mxu0 %v132_v4 }
 0x18f   :  { %797 = vmatprep.subr.bf16.mxu0 %v1135_v7 }
 0x192   :  { %798 = vmatpush1.bf16.msra.mxu0 %v1133_v8 }
 0x193   :  { %799 = vmatprep.subr.bf16.mxu0 %v1138_v9 }
 0x196   :  { %800 = vmatpush1.bf16.msra.mxu0 %v1136_v10 }
 0x197   :  { %801 = vmatprep.subr.bf16.mxu0 %v1141_v11 }
 0x19a   :  { %802 = vmatpush1.bf16.msra.mxu0 %v1139_v0 }
 0x19b   :  { %803 = vmatprep.subr.bf16.mxu0 %v1144_v1 }
 0x19e   :  { %804 = vmatpush1.bf16.msra.mxu0 %v1142_v12 }
 0x19f   :  { %805 = vmatprep.subr.bf16.mxu0 %v1147_v13 }
 0x1a2   :  { %806 = vmatpush1.bf16.msra.mxu0 %v1145_v14 }
 0x1a3   :  { %807 = vmatprep.subr.bf16.mxu0 %v1150_v15 }
 0x1a6   :  { %808 = vmatpush1.bf16.msra.mxu0 %v1148_v16 }
 0x1a7   :  { %809 = vmatprep.subr.bf16.mxu0 %v1153_v2 }
 0x1aa   :  { %810 = vmatpush1.bf16.msra.mxu0 %v1151_v5 }
 0x1ab   :  { %811 = vmatprep.subr.bf16.mxu0 %v1156_v17 }
 0x1ae   :  { %812 = vmatpush1.bf16.msra.mxu0 %v1154_v18 }
 0x1af   :  { %813 = vmatprep.subr.bf16.mxu0 %v1159_v19 }
 0x1b2   :  { %814 = vmatpush1.bf16.msra.mxu0 %v1157_v20 }
 0x1b3   :  { %815 = vmatprep.subr.bf16.mxu0 %v1162_v21 }
 0x1b6   :  { %816 = vmatpush1.bf16.msra.mxu0 %v1160_v22 }
 0x1b7   :  { %817 = vmatprep.subr.bf16.mxu0 %v1165_v23 }
 0x1ba   :  { %818 = vmatpush1.bf16.msra.mxu0 %v1163_v24 }
 0x1bb   :  { %819 = vmatprep.subr.bf16.mxu0 %v1168_v25 }
 0x1be   :  { %820 = vmatpush1.bf16.msra.mxu0 %v1166_v26 }
 0x1bf   :  { %821 = vmatprep.subr.bf16.mxu0 %v1171_v27 }
 0x1c2   :  { %822 = vmatpush1.bf16.msra.mxu0 %v1169_v28 }
 0x1c3   :  { %823 = vmatprep.subr.bf16.mxu0 %v1174_v29 }
 0x1c6   :  { %824 = vmatpush1.bf16.msra.mxu0 %v1172_v30 }
 0x1c7   :  { %825 = vmatprep.subr.bf16.mxu0 %v1177_v31 }
 0x1ca   :  { %826 = vmatpush1.bf16.msra.mxu0 %v1175_v32 }
 0x1cd   :  { %828 = vmatmul.mubr.bf16.vlgmr.msra.gmra.mrb[4].mxu0 %v1405_v6 }
 0x260   :  { %v743_v35 = vpop.f32.mrb[0].mxu0  ;;  %v786_v36 = vpop.f32.mrb[0].mxu1 }
 0x261   :  { %v842_v38 = vmul.f32 %v840_v34, %v743_v35  ;;  %v844_v39 = vmul.f32 %v840_v34, %v786_v36  ;;  %v745_v44 = vpop.f32.mrb[1].mxu0  ;;  %v788_v45 = vpop.f32.mrb[1].mxu1 }
 0x262   :  { %v843_v46 = vmul.f32 %v840_v34, %v745_v44  ;;  %v845_v47 = vmul.f32 %v840_v34, %v788_v45  ;;  %v747_v48 = vpop.f32.mrb[2].mxu0  ;;  %v790_v49 = vpop.f32.mrb[2].mxu1 }
 0x263   :  { %v848_v50 = vmul.f32 %v841_v37, %v747_v48  ;;  %v850_v51 = vmul.f32 %v841_v37, %v790_v49  ;;  %v749_v52 = vpop.f32.mrb[3].mxu0  ;;  %v792_v53 = vpop.f32.mrb[3].mxu1 }
 0x264   :  { %v1016_v54 = vpack.c.bf16 %v843_v46, %v842_v38  ;;  %v1017_v40 = vpack.c.bf16 %v845_v47, %v844_v39  ;;  %v849_v41 = vmul.f32 %v841_v37, %v749_v52  ;;  %v851_v55 = vmul.f32 %v841_v37, %v792_v53 }
 0x266   :  { %890 = vst [vmem:[#allocation9] sm:$0xff] %v1016_v54  ;;  %891 = vst [vmem:[#allocation9 + $0x8] sm:$0xff] %v1017_v40  ;;  %v1019_v42 = vpack.c.bf16 %v849_v41, %v848_v50  ;;  %v1020_v43 = vpack.c.bf16 %v851_v55, %v850_v51 }
 0x268   :  { %893 = vst [vmem:[#allocation9 + $0x18] sm:$0xff] %v1019_v42  ;;  %894 = vst [vmem:[#allocation9 + $0x20] sm:$0xff] %v1020_v43 }
 0x2a0   :  { %v829_v56 = vpop.f32.mrb[4].mxu0 }
 0x2a1   :  { %v846_v57 = vmul.f32 %v840_v34, %v829_v56  ;;  %v831_v58 = vpop.f32.mrb[5].mxu0 }
 0x2a2   :  { %v847_v59 = vmul.f32 %v840_v34, %v831_v58  ;;  %v833_v60 = vpop.f32.mrb[6].mxu0 }
 0x2a3   :  { %v852_v61 = vmul.f32 %v841_v37, %v833_v60  ;;  %v835_v3 = vpop.f32.mrb[7].mxu0 }
 0x2a4   :  { %v1018_v62 = vpack.c.bf16 %v847_v59, %v846_v57  ;;  %v853_v4 = vmul.f32 %v841_v37, %v835_v3 }
 0x2a6   :  { %892 = vst [vmem:[#allocation9 + $0x10] sm:$0xff] %v1018_v62  ;;  %v1021_v63 = vpack.c.bf16 %v853_v4, %v852_v61 }
 0x2a8   :  { %895 = vst [vmem:[#allocation9 + $0x28] sm:$0xff] %v1021_v63 }
 0x2a9   :  { %1263 = shalt.err (!%p1260_p0)
}
 0x2aa   :  { %s1264_s6 = scalar_lea.hbm %s1436_s4, 768 }
 0x2ab   :  { %p1265_p1 = scmp.ne.s32.totalorder %s1436_s4, %s1264_s6  ;;  %p1268_p2 = scmp.lt.u32.totalorder %s1264_s6, %s1436_s4 }
 0x2ad   :  { %p1270_p3 = pnand %p1268_p2, %p1265_p1 }
 0x2af   :  { %1273 = shalt.err (!%p1270_p3)
}
 0x2b0   :  { %907 = dma.vmem_to_hbm [thread:$0]  %s902_s28, 768, %s1436_s4, [#allocation5], %s1285_s0, %s1285_s0, %s1286_s18  }
 0x2b1   :  { %1278 = dma.done.wait [#allocation5], 768  }
 0x2b2   :  { %1279 = vsyncadd [#allocation5], 4294966528 }
 0x2b3   :  { %911 = vsyncpa [#allocation4], 1 }
 0x2b4   :  { %912 = vsyncpa [#allocation7], 1 }
 0x2b5   :  { %913 = vsyncpa [#allocation5], 1 }

</bundles_post_ra>
